<compile_context>
chip_gen: v6e
topology: v6e:2x2x1
jax: 0.10.0
libtpu: 0.0.40
codegen_flags: <defaults>
</compile_context>

<pallas_src>
import functools

import jax
import jax.numpy as jnp
import numpy as np
from jax import lax
from jax.experimental import pallas as pl
from jax.experimental.pallas import tpu as pltpu


_ONE_HOT_VOCAB_LIMIT = 2048  # rows (V + C); above this use a DMA row-gather path instead.


def _round_up(a, b):
    return ((a + b - 1) // b) * b


def _embed_kernel(x_ids_ref, pos_ids_ref, tbl_ref, out_ref, *, vocab_size):
    TB = out_ref.shape[0]
    VC = tbl_ref.shape[0]

    x_ids = x_ids_ref[...]                      # (TB, 1) int32, selects rows [0, V)
    p_ids = pos_ids_ref[...] + vocab_size       # (TB, 1) int32, selects rows [V, V+C)

    cols = lax.broadcasted_iota(jnp.int32, (TB, VC), 1)
    # Two-hot mask in the table's native dtype (bf16 tables -> full-rate MXU, no per-step
    # f32 cast of the whole table). Exactly two 1.0s per row -> exact gather + add under
    # f32 accumulation.
    two_hot = ((x_ids == cols) | (p_ids == cols)).astype(tbl_ref.dtype)

    out = jnp.dot(two_hot, tbl_ref[...], preferred_element_type=jnp.float32)  # (TB, D)
    out_ref[...] = out.astype(out_ref.dtype)
    # TODO(synk): training-mode dropout would pltpu.prng_seed(seed ^ pl.program_id(0)) once
    # per block, draw pltpu.prng_random_bits over (TB, D), mask, and scale by 1/(1-p).


def discrete_embedding(x, pos, tok_table, pos_table, *, token_block=2048, out_dtype=None):
    """Pallas equivalent of DiscreteEmbedding.forward(x, _pos) in eval mode.

    token_block: tokens per grid step. 2048 (a 1 MiB f32 output block at D=128) is a good
      default for v5e/v6e; on v7x (3.2 TB/s HBM, 64 MiB VMEM/TC) prefer 4096.
    out_dtype: emit a narrower activation dtype (e.g. bf16) to halve the dominant (N x D)
      output-store HBM traffic if downstream permits. Defaults to the table dtype.
    """
    B, T = x.shape
    V, D = tok_table.shape
    C, Dp = pos_table.shape
    assert D == Dp, "token / positional embedding dims must match"

    if V + C > _ONE_HOT_VOCAB_LIMIT:
        # TODO(synk): manual make_async_copy row-gather path (scalar-prefetched ids,
        # multi-row double-buffered DMA) for vocabularies too large for the two-hot path.
        raise NotImplementedError(
            f"vocabulary_size + context_len = {V + C} > {_ONE_HOT_VOCAB_LIMIT}: the "
            "VMEM-resident two-hot path only supports small vocabularies.")

    out_dtype = tok_table.dtype if out_dtype is None else jnp.dtype(out_dtype)
    N = B * T

    # Tokens per grid step: multiple of 8 (sublane-dense), capped at `token_block`.
    TB = min(int(token_block), _round_up(N, 8))
    Np = _round_up(N, TB)

    # Single fused table: rows [0, V) = token embeddings, rows [V, V+C) = positional.
    table = jnp.concatenate([tok_table, pos_table], axis=0)  # (V + C, D)

    x_flat = x.reshape(N).astype(jnp.int32)
    pos_flat = pos.reshape(N).astype(jnp.int32)
    if Np != N:
        x_flat = jnp.pad(x_flat, (0, Np - N))
        pos_flat = jnp.pad(pos_flat, (0, Np - N))
    x_col = x_flat.reshape(Np, 1)
    pos_col = pos_flat.reshape(Np, 1)

    grid = (Np // TB,)

    # Explicit VMEM budget: table x1 (whole-array resident, single-buffered) + output x2
    # (double-buffered) + id blocks x2 each (lane-padded to 128) + two-hot/iota
    # intermediates + headroom. Capped under v5e/v6e physical VMEM; the V+C cutoff keeps
    # this well inside v7x's 64 MiB/TC even with per-core table duplication.
    lane = 128
    tbl_bytes = _round_up(V + C, 8) * _round_up(D, lane) * table.dtype.itemsize
    out_bytes = 2 * TB * _round_up(D, lane) * out_dtype.itemsize
    id_bytes = 2 * 2 * TB * lane * 4
    tmp_bytes = 3 * TB * _round_up(V + C, lane) * 4
    vmem_limit = int(min(tbl_bytes + out_bytes + id_bytes + tmp_bytes + (8 << 20), 96 << 20))

    kernel = functools.partial(_embed_kernel, vocab_size=V)

    out = pl.pallas_call(
        kernel,
        out_shape=jax.ShapeDtypeStruct((Np, D), out_dtype),
        grid_spec=pltpu.PrefetchScalarGridSpec(
            num_scalar_prefetch=0,
            grid=grid,
            in_specs=[
                pl.BlockSpec((TB, 1), lambda i: (i, 0)),           # token ids (blocked)
                pl.BlockSpec((TB, 1), lambda i: (i, 0)),           # position ids (blocked)
                # Whole-array VMEM residency: one DMA total, single-buffered (no 2x copy).
                pl.BlockSpec(memory_space=pltpu.MemorySpace.VMEM),
            ],
            out_specs=pl.BlockSpec((TB, D), lambda i: (i, 0)),
        ),
        compiler_params=pltpu.CompilerParams(
            dimension_semantics=("parallel",),
            vmem_limit_bytes=vmem_limit,
        ),
    )(x_col, pos_col, table)

    return out[:N].reshape(B, T, D)


if __name__ == "__main__":
    # Small, deterministic problem consistent with the module's __init__:
    #   context_len=8, embedding_dims=128, vocabulary_size=32, dropout=identity(eval)
    B, T = 2, 8
    context_len = 8
    embedding_dims = 128
    vocabulary_size = 32

    key = jax.random.PRNGKey(0)
    k_tok, k_pos, k_x = jax.random.split(key, 3)

    tok_table = (0.02 * jax.random.normal(
        k_tok, (vocabulary_size, embedding_dims))).astype(jnp.float32)
    pos_table = (0.02 * jax.random.normal(
        k_pos, (context_len, embedding_dims))).astype(jnp.float32)

    x = jax.random.randint(k_x, (B, T), 0, vocabulary_size, dtype=jnp.int32)
    pos = jnp.tile(jnp.arange(T, dtype=jnp.int32)[None, :], (B, 1))

    # Pure-JAX reference: embedding(x) + positional(pos), dropout = identity (eval).
    ref = tok_table[x] + pos_table[pos]

    # Default (large) token block -> single grid step at this toy size.
    out = jax.block_until_ready(discrete_embedding(x, pos, tok_table, pos_table))
    np.testing.assert_allclose(np.asarray(out), np.asarray(ref), rtol=1e-6, atol=1e-6)

    # Small token block to also exercise the multi-step pipelined path.
    out2 = jax.block_until_ready(
        discrete_embedding(x, pos, tok_table, pos_table, token_block=8))
    np.testing.assert_allclose(np.asarray(out2), np.asarray(ref), rtol=1e-6, atol=1e-6)

    print("KERNEL_OK")
</pallas_src>

<mosaic_0001>
module attributes {stable_mosaic.version = 11 : i64} {
  func.func @_embed_kernel(%arg0: i32, %arg1: memref<16x1xi32, #tpu.memory_space<vmem>>, %arg2: memref<16x1xi32, #tpu.memory_space<vmem>>, %arg3: memref<40x128xf32, #tpu.memory_space<vmem>>, %arg4: memref<16x128xf32, #tpu.memory_space<vmem>>) attributes {dimension_semantics = [#tpu.dimension_semantics<parallel>], iteration_bounds = array<i64: 1>, scalar_prefetch = 0 : i64, scratch_operands = 0 : i64, tpu.core_type = #tpu.core_type<tc>, window_params = [{transform_indices = @transform_0, window_bounds = array<i64: 16, 1>}, {transform_indices = @transform_1, window_bounds = array<i64: 16, 1>}, {pipeline_mode = #tpu.pipeline_mode<synchronous>, transform_indices = @transform_2, window_bounds = array<i64: 40, 128>}, {transform_indices = @transform_3, window_bounds = array<i64: 16, 128>}]} {
    %c0 = arith.constant 0 : index
    %c0_0 = arith.constant 0 : index
    %0 = vector.load %arg1[%c0, %c0_0] : memref<16x1xi32, #tpu.memory_space<vmem>>, vector<16x1xi32>
    %c0_1 = arith.constant 0 : index
    %c0_2 = arith.constant 0 : index
    %1 = vector.load %arg2[%c0_1, %c0_2] : memref<16x1xi32, #tpu.memory_space<vmem>>, vector<16x1xi32>
    %c32_i32 = arith.constant 32 : i32
    %2 = vector.broadcast %c32_i32 : i32 to vector<16x1xi32>
    %3 = arith.addi %1, %2 : vector<16x1xi32>
    %4 = tpu.iota {dimensions = array<i32: 1>} : vector<16x40xi32>
    %5 = vector.broadcast %0 : vector<16x1xi32> to vector<16x40xi32>
    %6 = arith.cmpi eq, %5, %4 : vector<16x40xi32>
    %7 = vector.broadcast %3 : vector<16x1xi32> to vector<16x40xi32>
    %8 = arith.cmpi eq, %7, %4 : vector<16x40xi32>
    %9 = arith.ori %6, %8 : vector<16x40xi1>
    %10 = arith.extui %9 : vector<16x40xi1> to vector<16x40xi32>
    %11 = arith.sitofp %10 : vector<16x40xi32> to vector<16x40xf32>
    %c0_3 = arith.constant 0 : index
    %c0_4 = arith.constant 0 : index
    %12 = vector.load %arg3[%c0_3, %c0_4] : memref<40x128xf32, #tpu.memory_space<vmem>>, vector<40x128xf32>
    %cst = arith.constant dense<0.000000e+00> : vector<16x128xf32>
    %13 = tpu.matmul %11, %12, %cst {dimension_numbers = #tpu.dot_dimension_numbers<[1], [0], [0], [1], [0, 0, 1, 1], [], []>} : vector<16x40xf32>, vector<40x128xf32>, vector<16x128xf32> -> vector<16x128xf32>
    %c0_5 = arith.constant 0 : index
    %c0_6 = arith.constant 0 : index
    %14 = vector.load %arg4[%c0_5, %c0_6] : memref<16x128xf32, #tpu.memory_space<vmem>>, vector<16x128xf32>
    tpu.vector_store %arg4[%c0_5, %c0_6], %13 {strides = array<i32>} : memref<16x128xf32, #tpu.memory_space<vmem>>, vector<16x128xf32>,
    return
  }
  func.func @transform_0(%arg0: i32) -> (i32, i32) {
    %c0_i32 = arith.constant 0 : i32
    %c0_i32_0 = arith.constant 0 : i32
    return %arg0, %c0_i32 : i32, i32
  }
  func.func @transform_1(%arg0: i32) -> (i32, i32) {
    %c0_i32 = arith.constant 0 : i32
    %c0_i32_0 = arith.constant 0 : i32
    return %arg0, %c0_i32 : i32, i32
  }
  func.func @transform_2(%arg0: i32) -> (i32, i32) {
    %c0_i32 = arith.constant 0 : i32
    %c0_i32_0 = arith.constant 0 : i32
    %c0_i32_1 = arith.constant 0 : i32
    return %c0_i32, %c0_i32_0 : i32, i32
  }
  func.func @transform_3(%arg0: i32) -> (i32, i32) {
    %c0_i32 = arith.constant 0 : i32
    %c0_i32_0 = arith.constant 0 : i32
    return %arg0, %c0_i32 : i32, i32
  }
}

</mosaic_0001>

<bundles_post_ra>
// kernel: tpu_custom_call.1
= control target key start
LH: loop header
LB: loop body
LE: loop exit
PB: predicated region body
PF: predicated region fallthrough
CT: control target
= control target key end

     0   :  { %8 = vsyncpa [#allocation3], 0  ;;  %s291_s0 = inlined_call_operand.vmem [shape: s32[16,1], index: 0, kind: input, shape index: {}]   ;;  %s292_s1 = inlined_call_operand.vmem [shape: s32[16,1], index: 1, kind: input, shape index: {}]   ;;  %s293_s2 = inlined_call_operand.hbm [shape: f32[40,128], index: 2, kind: input, shape index: {}]   ;;  %s294_s3 = inlined_call_operand.hbm [shape: f32[16,128], index: 3, kind: output, shape index: {}]  }
   0x1   :  { %9 = vsyncpa [#allocation4], 0  ;;  %s241_s12 = smov [#allocation2]  }
   0x2   :  { %s19_s13 = sshll.u32 %s241_s12, 4  ;;  %s20_s13 = int_to_ptr.vmem [resolvable:$true] %s19_s13 }
   0x3   :  { %s205_s14 = scalar_lea.vmem %s20_s13, 640  ;;  %p210_p1 = scmp.lt.s32.totalorder %s20_s13, %s20_s13 }
   0x4   :  { %p206_p0 = scmp.ne.s32.totalorder %s20_s13, %s205_s14  ;;  %p211_p2 = scmp.lt.s32.totalorder %s205_s14, %s205_s14 }
   0x6   :  { %p212_p3 = por %p211_p2, %p210_p1 }
   0x8   :  { %p213_p4 = pnand %p212_p3, %p206_p0 }
   0xa   :  { %216 = shalt.err (!%p213_p4)
}
   0xb   :  { %s242_s15 = smov 128   ;;  %s243_s16 = smov 8  }
   0xc   :  { %25 = dma.hbm_to_vmem [thread:$0]  %s293_s2, 640, %s20_s13, [#allocation3], %s242_s15, %s242_s15, %s243_s16  }
   0xd   :  { %237 = dma.done.wait [#allocation3], 640  }
   0xe   :  { %238 = vsyncadd [#allocation3], 4294966656  ;;  %v244_v0 = vmov 0   ;;  %v30_v1 = vld [vmem:[%s291_s0 + $0x8] sm:$0xff]  ;;  %v29_v2 = vld [vmem:[%s291_s0] sm:$0xff]  ;;  %v35_v12 = vlaneseq  ;;  %vm64_vm5 = vcmask 326656  }
   0xf   :  { %196 = vset.pattern.permute.xlu1 %v244_v0  ;;  %195 = vset.pattern.permute.xlu0 %v244_v0  ;;  %v32_v3 = vld [vmem:[%s292_s1 + $0x8] sm:$0xff]  ;;  %v31_v5 = vld [vmem:[%s292_s1] sm:$0xff]  ;;  %v62_v7 = vld [vmem:[#allocation2 + $0x18] sm:$0xff]  ;;  %v245_v18 = vmov 0.0   ;;  %s246_s0 = smov [#allocation5]  }
  0x10   :  { %41 = vperm.xlu1 %196, %v30_v1   ;;  %38 = vperm.xlu0 %195, %v29_v2   ;;  %v34_v4 = vadd.s32 32, %v32_v3  ;;  %v63_v6 = vld [vmem:[#allocation2 + $0x20] sm:$0xff]  ;;  %v33_v8 = vadd.s32 32, %v31_v5  ;;  %v61_v9 = vld [vmem:[#allocation2 + $0x10] sm:$0xff]  ;;  %v60_v10 = vld [vmem:[#allocation2 + $0x8] sm:$0xff]  ;;  %v36_v15 = vand.u32 127, %v35_v12 }
  0x11   :  { %176 = vmatprep.subr.mxu0 %v63_v6  ;;  %v59_v11 = vld [vmem:[#allocation2] sm:$0xff]  ;;  %s153_s1 = sshll.u32 %s246_s0, 4  ;;  %s154_s1 = int_to_ptr.vmem [resolvable:$true] %s153_s1 }
  0x12   :  { %177 = vmatpush3.msra.mxu0 %v63_v6  ;;  %s217_s26 = scalar_lea.vmem %s154_s1, 256  ;;  %p222_p6 = scmp.lt.s32.totalorder %s154_s1, %s154_s1 }
  0x13   :  { %178 = vmatprep.subr.mxu0 %v62_v7  ;;  %p218_p5 = scmp.ne.s32.totalorder %s154_s1, %s217_s26  ;;  %p223_p7 = scmp.lt.s32.totalorder %s217_s26, %s217_s26 }
  0x14   :  { %49 = vperm.xlu1 %196, %v34_v4   ;;  %46 = vperm.xlu0 %195, %v33_v8  }
  0x15   :  { %179 = vmatpush3.msra.mxu0 %v62_v7  ;;  %p224_p8 = por %p223_p7, %p222_p6 }
  0x16   :  { %180 = vmatprep.subr.mxu0 %v61_v9 }
  0x17   :  { %181 = vmatpush3.msra.mxu0 %v61_v9  ;;  %p225_p9 = pnand %p224_p8, %p218_p5 }
  0x18   :  { %182 = vmatprep.subr.mxu0 %v60_v10 }
  0x19   :  { %183 = vmatpush3.msra.mxu0 %v60_v10 }
  0x1a   :  { %184 = vmatprep.subr.mxu0 %v59_v11 }
  0x1b   :  { %185 = vmatpush3.msra.mxu0 %v59_v11 }
  0x8b   :  { %v42_v13 = vpop.permute.xlu1 %41  ;;  %v39_v14 = vpop.permute.xlu0 %38 }
  0x8c   :  { %vm44_vm0 = vcmp.eq.s32.totalorder %v42_v13, %v36_v15  ;;  %vm43_vm3 = vcmp.eq.s32.totalorder %v39_v14, %v36_v15 }
  0x8f   :  { %v50_v16 = vpop.permute.xlu1 %49  ;;  %v47_v17 = vpop.permute.xlu0 %46 }
  0x90   :  { %vm52_vm1 = vcmp.eq.s32.totalorder %v50_v16, %v36_v15  ;;  %vm51_vm2 = vcmp.eq.s32.totalorder %v47_v17, %v36_v15 }
  0x91   :  { %vm54_vm4 = vmor %vm44_vm0, %vm52_vm1 }
  0x92   :  { %vm53_vm6 = vmor %vm43_vm3, %vm51_vm2  ;;  %v166_v19 = vsel %vm54_vm4, 1.0, %v245_v18 }
  0x93   :  { %v165_v20 = vsel %vm53_vm6, 1.0, %v245_v18 }
  0x94   :  { %186 = vmatprep.mubr.msk.f32.mxu0 %vm64_vm5, %v165_v20 }
  0x95   :  { %187 = vmatmul.mubr.msk.f32.vlgmr.msra.gmra.mxu0 %vm64_vm5, %v166_v19 }
 0x155   :  { %v188_v21 = vpop.f32.mrf.mxu0 }
 0x156   :  { %147 = vst [vmem:[#allocation5 + $0x8] sm:$0xff] %v188_v21 }
 0x157   :  { %v137_v22 = vpop.f32.mrf.mxu0 }
 0x158   :  { %146 = vst [vmem:[#allocation5] sm:$0xff] %v137_v22 }
 0x159   :  { %228 = shalt.err (!%p225_p9)
}
 0x15a   :  { %159 = dma.vmem_to_hbm [thread:$0]  %s154_s1, 256, %s294_s3, [#allocation4], %s242_s15, %s242_s15, %s243_s16  }
 0x15b   :  { %239 = dma.done.wait [#allocation4], 256  }
 0x15c   :  { %240 = vsyncadd [#allocation4], 4294967040 }
 0x15d   :  { %163 = vsyncpa [#allocation3], 1 }
 0x15e   :  { %164 = vsyncpa [#allocation4], 1 }

</bundles_post_ra>
